<compile_context>
chip_gen: v6e
topology: v6e:2x2x1
jax: 0.10.0
libtpu: 0.0.40
codegen_flags: <defaults>
</compile_context>

<pallas_src>
import functools

import jax
import jax.numpy as jnp
from jax import lax
from jax.experimental import pallas as pl
from jax.experimental.pallas import tpu as pltpu


def _cdiv(a, b):
    return -(-a // b)


def _round_up(n, m):
    return _cdiv(n, m) * m


def _choose_tiling(B, block_batch):
    """Pick (tile_batch, n_tiles).

    tile_batch is a multiple of 128 (lane-dense output), large enough to amortize
    per-grid-step overhead, derived from B so tail padding stays < one tile, and
    the batch is split into >=2 tiles whenever possible so v7x megacore can shard
    the grid across both TensorCores.
    """
    b128 = _round_up(max(B, 1), 128)
    if b128 <= 128:
        return 128, 1
    n_target = max(2, _cdiv(b128, block_batch))
    if n_target % 2:
        n_target += 1
    tb = _round_up(_cdiv(b128, n_target), 128)
    n_tiles = _cdiv(b128, tb)          # last tile always starts inside real data
    return tb, n_tiles


def _default_compute_dtype():
    """bf16 EUP/VPU exists on v6e/v7x; keep f32 on v5e and older."""
    try:
        kind = jax.devices()[0].device_kind.lower()
    except Exception:
        return jnp.float32
    if ("v6" in kind) or ("v7" in kind) or ("tpu7" in kind) or ("7x" in kind):
        return jnp.bfloat16
    return jnp.float32


def _mlp_kernel(x_ref, w1T_ref, b1c_ref, w2c_ref, b2_ref, o_ref, *, compute_dtype):
    # x_ref  : (TB, n_inputs)         VMEM  batch tile in native layout
    # w1T_ref: (n_neurons, n_inputs)  VMEM  resident across grid steps
    # b1c_ref: (n_neurons, 1)         VMEM  resident (f32)
    # w2c_ref: (n_neurons, 1)         VMEM  resident (f32)
    # b2_ref : (1, 1)                 SMEM  scalar
    # o_ref  : (1, TB)                VMEM  lane-dense output slab
    x = x_ref[...].astype(compute_dtype)          # cheap VPU cast; no-op for f32
    # Contract the n_inputs axis of both operands -> (n_neurons, TB): batch maps to
    # the 128-lane axis with no wrapper-side transpose.  MXU/XLU have slack here.
    hT = lax.dot_general(w1T_ref[...], x, (((1,), (1,)), ((), ())),
                         preferred_element_type=jnp.float32)
    # EUP tanh — the saturating unit.  bf16 on v6e/v7x, f32 on v5e.
    hT = jnp.tanh((hT + b1c_ref[...]).astype(compute_dtype))
    # Layer 2 has a single output unit -> VPU multiply + XLU sublane reduce (f32).
    z = jnp.sum(hT.astype(jnp.float32) * w2c_ref[...], axis=0, keepdims=True)
    z = z + b2_ref[0, 0]                          # SMEM scalar
    o_ref[...] = 100.0 * jax.nn.sigmoid(z)        # (1, TB) lane-dense store


@functools.partial(jax.jit, static_argnames=("block_batch", "compute_dtype"))
def _feedforward_nn_impl(x, w1, b1, w2, b2, *, block_batch, compute_dtype):
    B, n_inputs = x.shape
    n_neurons = w1.shape[1]

    tb, n_tiles = _choose_tiling(B, block_batch)
    b_pad = tb * n_tiles

    # Tiny weight-side layout plumbing only (192 floats); x stays untouched in HBM.
    w1_t = w1.T.astype(compute_dtype)                     # (n_neurons, n_inputs)
    b1_c = b1.reshape(n_neurons, 1).astype(jnp.float32)
    w2_c = w2.reshape(n_neurons, 1).astype(jnp.float32)
    b2_s = b2.reshape(1, 1).astype(jnp.float32)

    cost = pl.CostEstimate(
        flops=2 * n_neurons * n_inputs * b_pad + 2 * n_neurons * b_pad,
        transcendentals=(n_neurons + 1) * b_pad,
        bytes_accessed=(B * n_inputs + b_pad) * 4
        + (n_neurons * (n_inputs + 2) + 1) * 4,
    )

    out_t = pl.pallas_call(
        functools.partial(_mlp_kernel, compute_dtype=compute_dtype),
        out_shape=jax.ShapeDtypeStruct((1, b_pad), jnp.float32),
        grid=(n_tiles,),
        in_specs=[
            pl.BlockSpec((tb, n_inputs), lambda i: (i, 0)),          # x tile (native layout)
            pl.BlockSpec((n_neurons, n_inputs), lambda i: (0, 0)),   # W1^T resident
            pl.BlockSpec((n_neurons, 1), lambda i: (0, 0)),          # b1 resident
            pl.BlockSpec((n_neurons, 1), lambda i: (0, 0)),          # w2 resident
            pl.BlockSpec(memory_space=pltpu.MemorySpace.SMEM),       # b2 scalar
        ],
        out_specs=pl.BlockSpec((1, tb), lambda i: (0, i)),           # lane-dense out
        compiler_params=pltpu.CompilerParams(
            dimension_semantics=("parallel",)),                      # v7x megacore split
        cost_estimate=cost,
    )(x.astype(jnp.float32), w1_t, b1_c, w2_c, b2_s)

    # Padded columns (boundary-block tail) are independent and sliced off here.
    return out_t[0, :B].reshape(B, 1)


def feedforward_nn(x, w1, b1, w2, b2, *, block_batch=8192, compute_dtype=None):
    """x: (B, n_inputs) f32 -> (B, 1) f32.

    Params use the transposed-vs-PyTorch-nn.Linear layout:
      w1: (n_inputs, n_neurons), b1: (1, n_neurons), w2: (n_neurons, 1), b2: (1, 1).
    compute_dtype=None auto-selects bf16 tanh on v6e/v7x and f32 on v5e/older.
    """
    if compute_dtype is None:
        compute_dtype = _default_compute_dtype()
    return _feedforward_nn_impl(x, w1, b1, w2, b2,
                                block_batch=int(block_batch),
                                compute_dtype=jnp.dtype(compute_dtype))


def init_params(key, n_inputs=3, n_neurons=64):
    """Deterministic init matching torch.nn.Linear default (uniform +-1/sqrt(fan_in))."""
    k1, k2, k3, k4 = jax.random.split(key, 4)
    lim1 = 1.0 / jnp.sqrt(float(n_inputs))
    lim2 = 1.0 / jnp.sqrt(float(n_neurons))
    w1 = jax.random.uniform(k1, (n_inputs, n_neurons), jnp.float32, -lim1, lim1)
    b1 = jax.random.uniform(k2, (1, n_neurons), jnp.float32, -lim1, lim1)
    w2 = jax.random.uniform(k3, (n_neurons, 1), jnp.float32, -lim2, lim2)
    b2 = jax.random.uniform(k4, (1, 1), jnp.float32, -lim2, lim2)
    return w1, b1, w2, b2


def _ref_forward(x, w1, b1, w2, b2):
    return 100.0 * jax.nn.sigmoid(jnp.tanh(x @ w1 + b1) @ w2 + b2)


# TODO(synk): training utilities (fit / create_data_loader / predict with SGD +
# MSELoss) are host-side PyTorch plumbing, not part of the forward pass; only
# forward() is implemented as a Pallas kernel.

if __name__ == "__main__":
    key = jax.random.PRNGKey(0)
    kx, kp = jax.random.split(key)

    # Small shapes consistent with the module defaults.
    B, n_inputs, n_neurons = 8, 3, 64
    x = jax.random.normal(kx, (B, n_inputs), dtype=jnp.float32)
    w1, b1, w2, b2 = init_params(kp, n_inputs, n_neurons)
    ref = _ref_forward(x, w1, b1, w2, b2)

    # Explicit f32 path (valid on all chips), tight tolerance.
    out = jax.block_until_ready(
        feedforward_nn(x, w1, b1, w2, b2, compute_dtype=jnp.float32))
    assert out.shape == (B, 1)
    assert jnp.allclose(out, ref, atol=1e-3, rtol=1e-4), float(jnp.max(jnp.abs(out - ref)))

    # Multi-tile grid + tail handling via Pallas boundary blocks (no wrapper pad).
    B2 = 300
    x2 = jax.random.normal(kx, (B2, n_inputs), dtype=jnp.float32)
    ref2 = _ref_forward(x2, w1, b1, w2, b2)
    out2 = jax.block_until_ready(
        feedforward_nn(x2, w1, b1, w2, b2, block_batch=128, compute_dtype=jnp.float32))
    assert out2.shape == (B2, 1)
    assert jnp.allclose(out2, ref2, atol=1e-3, rtol=1e-4), float(jnp.max(jnp.abs(out2 - ref2)))

    # Auto path (bf16 tanh on v6e/v7x, f32 elsewhere). Output scale is 0..100, so
    # the bf16 path needs a looser absolute tolerance.
    out3 = jax.block_until_ready(feedforward_nn(x2, w1, b1, w2, b2))
    assert out3.shape == (B2, 1)
    assert jnp.allclose(out3, ref2, atol=1.0, rtol=2e-2), float(jnp.max(jnp.abs(out3 - ref2)))

    print("KERNEL_OK")
</pallas_src>

<mosaic_0001>
module attributes {stable_mosaic.version = 11 : i64} {
  func.func @_mlp_kernel(%arg0: i32, %arg1: memref<128x3xf32, #tpu.memory_space<vmem>>, %arg2: memref<64x3xf32, #tpu.memory_space<vmem>>, %arg3: memref<64x1xf32, #tpu.memory_space<vmem>>, %arg4: memref<64x1xf32, #tpu.memory_space<vmem>>, %arg5: memref<1x1xf32, #tpu.memory_space<smem>>, %arg6: memref<1x128xf32, #tpu.memory_space<vmem>>) attributes {dimension_semantics = [#tpu.dimension_semantics<parallel>], iteration_bounds = array<i64: 1>, scalar_prefetch = 0 : i64, scratch_operands = 0 : i64, tpu.core_type = #tpu.core_type<tc>, window_params = [{transform_indices = @transform_0, window_bounds = array<i64: 128, 3>}, {pipeline_mode = #tpu.pipeline_mode<synchronous>, transform_indices = @transform_1, window_bounds = array<i64: 64, 3>}, {pipeline_mode = #tpu.pipeline_mode<synchronous>, transform_indices = @transform_2, window_bounds = array<i64: 64, 1>}, {pipeline_mode = #tpu.pipeline_mode<synchronous>, transform_indices = @transform_3, window_bounds = array<i64: 64, 1>}, {transform_indices = @transform_4, window_bounds = array<i64: 1, 1>}, {transform_indices = @transform_5, window_bounds = array<i64: 1, 128>}]} {
    %c0 = arith.constant 0 : index
    %c0_0 = arith.constant 0 : index
    %0 = vector.load %arg1[%c0, %c0_0] : memref<128x3xf32, #tpu.memory_space<vmem>>, vector<128x3xf32>
    %c0_1 = arith.constant 0 : index
    %c0_2 = arith.constant 0 : index
    %1 = vector.load %arg2[%c0_1, %c0_2] : memref<64x3xf32, #tpu.memory_space<vmem>>, vector<64x3xf32>
    %cst = arith.constant dense<0.000000e+00> : vector<64x128xf32>
    %2 = tpu.matmul %1, %0, %cst {dimension_numbers = #tpu.dot_dimension_numbers<[1], [1], [0], [0], [0, 0, 1, 0], [], []>} : vector<64x3xf32>, vector<128x3xf32>, vector<64x128xf32> -> vector<64x128xf32>
    %c0_3 = arith.constant 0 : index
    %c0_4 = arith.constant 0 : index
    %3 = vector.load %arg3[%c0_3, %c0_4] : memref<64x1xf32, #tpu.memory_space<vmem>>, vector<64x1xf32>
    %4 = vector.broadcast %3 : vector<64x1xf32> to vector<64x128xf32>
    %5 = arith.addf %2, %4 : vector<64x128xf32>
    %6 = math.tanh %5 : vector<64x128xf32>
    %c0_5 = arith.constant 0 : index
    %c0_6 = arith.constant 0 : index
    %7 = vector.load %arg4[%c0_5, %c0_6] : memref<64x1xf32, #tpu.memory_space<vmem>>, vector<64x1xf32>
    %8 = vector.broadcast %7 : vector<64x1xf32> to vector<64x128xf32>
    %9 = arith.mulf %6, %8 : vector<64x128xf32>
    %cst_7 = arith.constant dense<0.000000e+00> : vector<128xf32>
    %10 = vector.multi_reduction <add>, %9, %cst_7 [0] : vector<64x128xf32> to vector<128xf32>
    %11 = vector.shape_cast %10 : vector<128xf32> to vector<1x128xf32>
    %c0_8 = arith.constant 0 : index
    %c0_9 = arith.constant 0 : index
    %12 = memref.load %arg5[%c0_8, %c0_9] : memref<1x1xf32, #tpu.memory_space<smem>>
    %13 = vector.broadcast %12 : f32 to vector<1x128xf32>
    %14 = arith.addf %11, %13 : vector<1x128xf32>
    %15 = arith.negf %14 : vector<1x128xf32>
    %16 = math.exp %15 : vector<1x128xf32>
    %cst_10 = arith.constant 1.000000e+00 : f32
    %17 = vector.broadcast %cst_10 : f32 to vector<1x128xf32>
    %18 = arith.addf %17, %16 : vector<1x128xf32>
    %19 = arith.divf %17, %18 : vector<1x128xf32>
    %cst_11 = arith.constant 1.000000e+02 : f32
    %20 = vector.broadcast %cst_11 : f32 to vector<1x128xf32>
    %21 = arith.mulf %20, %19 : vector<1x128xf32>
    %c0_12 = arith.constant 0 : index
    %c0_13 = arith.constant 0 : index
    %22 = vector.load %arg6[%c0_12, %c0_13] : memref<1x128xf32, #tpu.memory_space<vmem>>, vector<1x128xf32>
    tpu.vector_store %arg6[%c0_12, %c0_13], %21 {strides = array<i32>} : memref<1x128xf32, #tpu.memory_space<vmem>>, vector<1x128xf32>,
    return
  }
  func.func @transform_0(%arg0: i32) -> (i32, i32) {
    %c0_i32 = arith.constant 0 : i32
    %c0_i32_0 = arith.constant 0 : i32
    return %arg0, %c0_i32 : i32, i32
  }
  func.func @transform_1(%arg0: i32) -> (i32, i32) {
    %c0_i32 = arith.constant 0 : i32
    %c0_i32_0 = arith.constant 0 : i32
    %c0_i32_1 = arith.constant 0 : i32
    return %c0_i32, %c0_i32_0 : i32, i32
  }
  func.func @transform_2(%arg0: i32) -> (i32, i32) {
    %c0_i32 = arith.constant 0 : i32
    %c0_i32_0 = arith.constant 0 : i32
    %c0_i32_1 = arith.constant 0 : i32
    return %c0_i32, %c0_i32_0 : i32, i32
  }
  func.func @transform_3(%arg0: i32) -> (i32, i32) {
    %c0_i32 = arith.constant 0 : i32
    %c0_i32_0 = arith.constant 0 : i32
    %c0_i32_1 = arith.constant 0 : i32
    return %c0_i32, %c0_i32_0 : i32, i32
  }
  func.func @transform_4(%arg0: i32) -> (i32, i32) {
    %c0_i32 = arith.constant 0 : i32
    %c0_i32_0 = arith.constant 0 : i32
    %c0_i32_1 = arith.constant 0 : i32
    return %c0_i32, %c0_i32_0 : i32, i32
  }
  func.func @transform_5(%arg0: i32) -> (i32, i32) {
    %c0_i32 = arith.constant 0 : i32
    %c0_i32_0 = arith.constant 0 : i32
    return %c0_i32, %arg0 : i32, i32
  }
}

</mosaic_0001>

<bundles_post_ra>
// kernel: _feedforward_nn_impl.1
= control target key start
LH: loop header
LB: loop body
LE: loop exit
PB: predicated region body
PF: predicated region fallthrough
CT: control target
= control target key end

     0   :  { %vm93_vm0 = vcmask 23552   ;;  %v511_v2 = vmov 0   ;;  %s740_s0 = inlined_call_operand.vmem [shape: f32[8,3], index: 0, kind: input, shape index: {}]   ;;  %s741_s1 = inlined_call_operand.vmem [shape: f32[64,3], index: 1, kind: input, shape index: {}]   ;;  %s742_s2 = inlined_call_operand.vmem [shape: f32[64,1], index: 2, kind: input, shape index: {}]   ;;  %s743_s3 = inlined_call_operand.vmem [shape: f32[64,1], index: 3, kind: input, shape index: {}]   ;;  %s744_s4 = inlined_call_operand.<no memory space> [shape: f32[1,1], index: 4, kind: input, shape index: {}]   ;;  %s745_s5 = inlined_call_operand.vmem [shape: f32[1,128], index: 5, kind: output, shape index: {}]  }
   0x1   :  { %v36_v0 = vld [vmem:[%s740_s0 + $0x78] sm:$0xff]  ;;  %v35_v1 = vld [vmem:[%s740_s0 + $0x70] sm:$0xff]  ;;  %489 = vset.pattern.permute.xlu0 %v511_v2  ;;  %490 = vset.pattern.permute.xlu1 %v511_v2  ;;  %v34_v3 = vld [vmem:[%s740_s0 + $0x68] sm:$0xff] }
   0x2   :  { %412 = vmatprep.subr.msk.mxu0 %vm93_vm0, %v36_v0  ;;  %456 = vmatprep.subr.msk.mxu1 %vm93_vm0, %v36_v0  ;;  %v37_v4 = vld [vmem:[%s741_s1] sm:$0xff]  ;;  %v47_v8 = vld [vmem:[%s742_s2 + $0x10] sm:$0xff]  ;;  %v46_v9 = vld [vmem:[%s742_s2 + $0x8] sm:$0xff] }
   0x3   :  { %413 = vmatpush3.xpose.msk.msra.mxu0 %vm93_vm0, %v36_v0  ;;  %472 = vmatpush3.xpose.msk.msra.mxu1 %vm93_vm0, %v36_v0  ;;  %v41_v5 = vld [vmem:[%s741_s1 + $0x20] sm:$0xff]  ;;  %v48_v10 = vld [vmem:[%s742_s2 + $0x18] sm:$0xff]  ;;  %v50_v13 = vld [vmem:[%s742_s2 + $0x28] sm:$0xff] }
   0x4   :  { %414 = vmatprep.subr.msk.mxu0 %vm93_vm0, %v35_v1  ;;  %457 = vmatprep.subr.msk.mxu1 %vm93_vm0, %v35_v1  ;;  %v33_v6 = vld [vmem:[%s740_s0 + $0x60] sm:$0xff]  ;;  %v32_v11 = vld [vmem:[%s740_s0 + $0x58] sm:$0xff]  ;;  %v31_v14 = vld [vmem:[%s740_s0 + $0x50] sm:$0xff] }
   0x5   :  { %444 = vmatprep.mubr.msk.f32.mxu0 %vm93_vm0, %v37_v4  ;;  %450 = vmatprep.mubr.msk.f32.mxu1 %vm93_vm0, %v41_v5  ;;  %v45_v7 = vld [vmem:[%s742_s2] sm:$0xff]  ;;  %v51_v15 = vld [vmem:[%s742_s2 + $0x30] sm:$0xff]  ;;  %v52_v16 = vld [vmem:[%s742_s2 + $0x38] sm:$0xff] }
   0x6   :  { %55 = vperm.xlu0 %489, %v45_v7   ;;  %65 = vperm.xlu1 %490, %v47_v8   ;;  %v49_v12 = vld [vmem:[%s742_s2 + $0x20] sm:$0xff]  ;;  %v30_v17 = vld [vmem:[%s740_s0 + $0x48] sm:$0xff]  ;;  %v281_v21 = vld [vmem:[%s743_s3 + $0x10] sm:$0xff] }
   0x7   :  { %415 = vmatpush3.xpose.msk.msra.mxu0 %vm93_vm0, %v35_v1  ;;  %473 = vmatpush3.xpose.msk.msra.mxu1 %vm93_vm0, %v35_v1  ;;  %v279_v18 = vld [vmem:[%s743_s3] sm:$0xff]  ;;  %v280_v19 = vld [vmem:[%s743_s3 + $0x8] sm:$0xff]  ;;  %v282_v22 = vld [vmem:[%s743_s3 + $0x18] sm:$0xff] }
   0x8   :  { %416 = vmatprep.subr.msk.mxu0 %vm93_vm0, %v34_v3  ;;  %458 = vmatprep.subr.msk.mxu1 %vm93_vm0, %v34_v3  ;;  %v29_v20 = vld [vmem:[%s740_s0 + $0x40] sm:$0xff]  ;;  %v28_v23 = vld [vmem:[%s740_s0 + $0x38] sm:$0xff]  ;;  %v284_v25 = vld [vmem:[%s743_s3 + $0x28] sm:$0xff] }
   0x9   :  { %v283_v24 = vld [vmem:[%s743_s3 + $0x20] sm:$0xff]  ;;  %v27_v26 = vld [vmem:[%s740_s0 + $0x30] sm:$0xff]  ;;  %v286_v28 = vld [vmem:[%s743_s3 + $0x38] sm:$0xff] }
   0xa   :  { %60 = vperm.xlu0 %489, %v46_v9   ;;  %70 = vperm.xlu1 %490, %v48_v10   ;;  %v285_v27 = vld [vmem:[%s743_s3 + $0x30] sm:$0xff]  ;;  %v26_v29 = vld [vmem:[%s740_s0 + $0x28] sm:$0xff]  ;;  %v25_v30 = vld [vmem:[%s740_s0 + $0x20] sm:$0xff] }
   0xb   :  { %417 = vmatpush3.xpose.msk.msra.mxu0 %vm93_vm0, %v34_v3  ;;  %474 = vmatpush3.xpose.msk.msra.mxu1 %vm93_vm0, %v34_v3  ;;  %v24_v31 = vld [vmem:[%s740_s0 + $0x18] sm:$0xff]  ;;  %v23_v32 = vld [vmem:[%s740_s0 + $0x10] sm:$0xff]  ;;  %v22_v33 = vld [vmem:[%s740_s0 + $0x8] sm:$0xff] }
   0xc   :  { %418 = vmatprep.subr.msk.mxu0 %vm93_vm0, %v33_v6  ;;  %459 = vmatprep.subr.msk.mxu1 %vm93_vm0, %v33_v6  ;;  %v21_v34 = vld [vmem:[%s740_s0] sm:$0xff]  ;;  %v38_v35 = vld [vmem:[%s741_s1 + $0x8] sm:$0xff]  ;;  %v39_v37 = vld [vmem:[%s741_s1 + $0x10] sm:$0xff] }
   0xd   :  { %v42_v36 = vld [vmem:[%s741_s1 + $0x28] sm:$0xff]  ;;  %v43_v38 = vld [vmem:[%s741_s1 + $0x30] sm:$0xff]  ;;  %v40_v39 = vld [vmem:[%s741_s1 + $0x18] sm:$0xff] }
   0xe   :  { %75 = vperm.xlu0 %489, %v49_v12   ;;  %80 = vperm.xlu1 %490, %v50_v13   ;;  %v44_v40 = vld [vmem:[%s741_s1 + $0x38] sm:$0xff] }
   0xf   :  { %419 = vmatpush3.xpose.msk.msra.mxu0 %vm93_vm0, %v33_v6  ;;  %475 = vmatpush3.xpose.msk.msra.mxu1 %vm93_vm0, %v33_v6 }
  0x10   :  { %420 = vmatprep.subr.msk.mxu0 %vm93_vm0, %v32_v11  ;;  %460 = vmatprep.subr.msk.mxu1 %vm93_vm0, %v32_v11 }
  0x12   :  { %85 = vperm.xlu0 %489, %v51_v15   ;;  %90 = vperm.xlu1 %490, %v52_v16  }
  0x13   :  { %421 = vmatpush3.xpose.msk.msra.mxu0 %vm93_vm0, %v32_v11  ;;  %476 = vmatpush3.xpose.msk.msra.mxu1 %vm93_vm0, %v32_v11 }
  0x14   :  { %422 = vmatprep.subr.msk.mxu0 %vm93_vm0, %v31_v14  ;;  %461 = vmatprep.subr.msk.mxu1 %vm93_vm0, %v31_v14 }
  0x16   :  { %289 = vperm.xlu0 %489, %v279_v18   ;;  %294 = vperm.xlu1 %490, %v280_v19  }
  0x17   :  { %423 = vmatpush3.xpose.msk.msra.mxu0 %vm93_vm0, %v31_v14  ;;  %477 = vmatpush3.xpose.msk.msra.mxu1 %vm93_vm0, %v31_v14 }
  0x18   :  { %424 = vmatprep.subr.msk.mxu0 %vm93_vm0, %v30_v17  ;;  %462 = vmatprep.subr.msk.mxu1 %vm93_vm0, %v30_v17 }
  0x1a   :  { %299 = vperm.xlu0 %489, %v281_v21   ;;  %304 = vperm.xlu1 %490, %v282_v22  }
  0x1b   :  { %425 = vmatpush3.xpose.msk.msra.mxu0 %vm93_vm0, %v30_v17  ;;  %478 = vmatpush3.xpose.msk.msra.mxu1 %vm93_vm0, %v30_v17 }
  0x1c   :  { %426 = vmatprep.subr.msk.mxu0 %vm93_vm0, %v29_v20  ;;  %463 = vmatprep.subr.msk.mxu1 %vm93_vm0, %v29_v20 }
  0x1e   :  { %309 = vperm.xlu0 %489, %v283_v24   ;;  %314 = vperm.xlu1 %490, %v284_v25  }
  0x1f   :  { %427 = vmatpush3.xpose.msk.msra.mxu0 %vm93_vm0, %v29_v20  ;;  %479 = vmatpush3.xpose.msk.msra.mxu1 %vm93_vm0, %v29_v20 }
  0x20   :  { %428 = vmatprep.subr.msk.mxu0 %vm93_vm0, %v28_v23  ;;  %464 = vmatprep.subr.msk.mxu1 %vm93_vm0, %v28_v23 }
  0x22   :  { %319 = vperm.xlu0 %489, %v285_v27   ;;  %324 = vperm.xlu1 %490, %v286_v28  }
  0x23   :  { %429 = vmatpush3.xpose.msk.msra.mxu0 %vm93_vm0, %v28_v23  ;;  %480 = vmatpush3.xpose.msk.msra.mxu1 %vm93_vm0, %v28_v23 }
  0x24   :  { %430 = vmatprep.subr.msk.mxu0 %vm93_vm0, %v27_v26  ;;  %465 = vmatprep.subr.msk.mxu1 %vm93_vm0, %v27_v26 }
  0x27   :  { %431 = vmatpush3.xpose.msk.msra.mxu0 %vm93_vm0, %v27_v26  ;;  %481 = vmatpush3.xpose.msk.msra.mxu1 %vm93_vm0, %v27_v26 }
  0x28   :  { %432 = vmatprep.subr.msk.mxu0 %vm93_vm0, %v26_v29  ;;  %466 = vmatprep.subr.msk.mxu1 %vm93_vm0, %v26_v29 }
  0x2b   :  { %433 = vmatpush3.xpose.msk.msra.mxu0 %vm93_vm0, %v26_v29  ;;  %482 = vmatpush3.xpose.msk.msra.mxu1 %vm93_vm0, %v26_v29 }
  0x2c   :  { %434 = vmatprep.subr.msk.mxu0 %vm93_vm0, %v25_v30  ;;  %467 = vmatprep.subr.msk.mxu1 %vm93_vm0, %v25_v30 }
  0x2f   :  { %435 = vmatpush3.xpose.msk.msra.mxu0 %vm93_vm0, %v25_v30  ;;  %483 = vmatpush3.xpose.msk.msra.mxu1 %vm93_vm0, %v25_v30 }
  0x30   :  { %436 = vmatprep.subr.msk.mxu0 %vm93_vm0, %v24_v31  ;;  %468 = vmatprep.subr.msk.mxu1 %vm93_vm0, %v24_v31 }
  0x33   :  { %437 = vmatpush3.xpose.msk.msra.mxu0 %vm93_vm0, %v24_v31  ;;  %484 = vmatpush3.xpose.msk.msra.mxu1 %vm93_vm0, %v24_v31 }
  0x34   :  { %438 = vmatprep.subr.msk.mxu0 %vm93_vm0, %v23_v32  ;;  %469 = vmatprep.subr.msk.mxu1 %vm93_vm0, %v23_v32 }
  0x37   :  { %439 = vmatpush3.xpose.msk.msra.mxu0 %vm93_vm0, %v23_v32  ;;  %485 = vmatpush3.xpose.msk.msra.mxu1 %vm93_vm0, %v23_v32 }
  0x38   :  { %440 = vmatprep.subr.msk.mxu0 %vm93_vm0, %v22_v33  ;;  %470 = vmatprep.subr.msk.mxu1 %vm93_vm0, %v22_v33 }
  0x3b   :  { %441 = vmatpush3.xpose.msk.msra.mxu0 %vm93_vm0, %v22_v33  ;;  %486 = vmatpush3.xpose.msk.msra.mxu1 %vm93_vm0, %v22_v33 }
  0x3c   :  { %442 = vmatprep.subr.msk.mxu0 %vm93_vm0, %v21_v34  ;;  %471 = vmatprep.subr.msk.mxu1 %vm93_vm0, %v21_v34 }
  0x3f   :  { %443 = vmatpush3.xpose.msk.msra.mxu0 %vm93_vm0, %v21_v34  ;;  %487 = vmatpush3.xpose.msk.msra.mxu1 %vm93_vm0, %v21_v34 }
  0x42   :  { %445 = vmatmul.mubr.msk.f32.vlgmr.msra.gmra.mxu0 %vm93_vm0, %v38_v35  ;;  %451 = vmatmul.mubr.msk.f32.vlgmr.msra.gmra.mxu1 %vm93_vm0, %v42_v36 }
  0x43   :  { %447 = vmatprep.mubr.msk.f32.mxu0 %vm93_vm0, %v39_v37  ;;  %453 = vmatprep.mubr.msk.f32.mxu1 %vm93_vm0, %v43_v38  ;;  %v349_v37 = vstv %s744_s4 }
  0x46   :  { %448 = vmatmul.mubr.msk.f32.gmra.mxu0 %vm93_vm0, %v40_v39  ;;  %454 = vmatmul.mubr.msk.f32.gmra.mxu1 %vm93_vm0, %v44_v40 }
  0x81   :  { %v56_v41 = vpop.permute.xlu0 %55  ;;  %v66_v42 = vpop.permute.xlu1 %65 }
  0x85   :  { %v61_v43 = vpop.permute.xlu0 %60  ;;  %v71_v44 = vpop.permute.xlu1 %70 }
  0x89   :  { %v76_v45 = vpop.permute.xlu0 %75  ;;  %v81_v48 = vpop.permute.xlu1 %80 }
  0x8d   :  { %v86_v56 = vpop.permute.xlu0 %85  ;;  %v91_v60 = vpop.permute.xlu1 %90 }
  0x91   :  { %v290_v0 = vpop.permute.xlu0 %289  ;;  %v295_v2 = vpop.permute.xlu1 %294 }
  0x95   :  { %v300_v5 = vpop.permute.xlu0 %299  ;;  %v305_v7 = vpop.permute.xlu1 %304 }
  0x99   :  { %v310_v14 = vpop.permute.xlu0 %309  ;;  %v315_v18 = vpop.permute.xlu1 %314 }
  0x9d   :  { %v320_v25 = vpop.permute.xlu0 %319  ;;  %v325_v28 = vpop.permute.xlu1 %324 }
 0x102   :  { %v446_v46 = vpop.f32.mrf.mxu0  ;;  %v452_v47 = vpop.f32.mrf.mxu1 }
 0x103   :  { %v238_v49 = vadd.f32 %v446_v46, %v61_v43  ;;  %v258_v62 = vadd.f32 %v452_v47, %v81_v48 }
 0x104   :  { %v232_v50 = vpop.f32.mrf.mxu0  ;;  %v252_v51 = vpop.f32.mrf.mxu1 }
 0x105   :  { %v233_v52 = vadd.f32 %v232_v50, %v56_v41  ;;  %491 = vtanh.f32 %v238_v49  ;;  %v253_v58 = vadd.f32 %v252_v51, %v76_v45 }
 0x106   :  { %v449_v53 = vpop.f32.mrf.mxu0  ;;  %v455_v54 = vpop.f32.mrf.mxu1 }
 0x107   :  { %493 = vtanh.f32 %v233_v52  ;;  %v248_v55 = vadd.f32 %v449_v53, %v71_v44  ;;  %v268_v1 = vadd.f32 %v455_v54, %v91_v60 }
 0x108   :  { %v242_v57 = vpop.f32.mrf.mxu0  ;;  %v262_v61 = vpop.f32.mrf.mxu1 }
 0x109   :  { %v243_v59 = vadd.f32 %v242_v57, %v66_v42  ;;  %495 = vtanh.f32 %v248_v55  ;;  %v263_v63 = vadd.f32 %v262_v61, %v86_v56 }
 0x10b   :  { %497 = vtanh.f32 %v243_v59 }
 0x10c   :  { %499 = vtanh.f32 %v253_v58 }
 0x10d   :  { %501 = vtanh.f32 %v258_v62 }
 0x10e   :  { %503 = vtanh.f32 %v263_v63 }
 0x10f   :  { %505 = vtanh.f32 %v268_v1 }
 0x112   :  { %v492_v3 = vpop.eup %491 }
 0x113   :  { %v328_v9 = vmul.f32 %v492_v3, %v295_v2 }
 0x114   :  { %v494_v4 = vpop.eup %493 }
 0x115   :  { %v327_v6 = vmul.f32 %v494_v4, %v290_v0 }
 0x116   :  { %v496_v8 = vpop.eup %495 }
 0x117   :  { %v335_v11 = vadd.f32 %v328_v9, %v327_v6  ;;  %v330_v15 = vmul.f32 %v496_v8, %v305_v7 }
 0x118   :  { %v498_v10 = vpop.eup %497 }
 0x119   :  { %v329_v12 = vmul.f32 %v498_v10, %v300_v5  ;;  %v500_v13 = vpop.eup %499 }
 0x11a   :  { %v502_v17 = vpop.eup %501  ;;  %v331_v19 = vmul.f32 %v500_v13, %v310_v14 }
 0x11b   :  { %v336_v16 = vadd.f32 %v335_v11, %v329_v12  ;;  %v504_v21 = vpop.eup %503  ;;  %v332_v22 = vmul.f32 %v502_v17, %v315_v18 }
 0x11c   :  { %v506_v24 = vpop.eup %505  ;;  %v333_v26 = vmul.f32 %v504_v21, %v320_v25 }
 0x11d   :  { %v337_v20 = vadd.f32 %v336_v16, %v330_v15  ;;  %v334_v29 = vmul.f32 %v506_v24, %v325_v28 }
 0x11f   :  { %v338_v23 = vadd.f32 %v337_v20, %v331_v19 }
 0x121   :  { %v339_v27 = vadd.f32 %v338_v23, %v332_v22 }
 0x123   :  { %v340_v30 = vadd.f32 %v339_v27, %v333_v26 }
 0x125   :  { %v341_v31 = vadd.f32 %v340_v30, %v334_v29 }
 0x127   :  { %v342_v32 = vrot.slane %v341_v31, 4 }
 0x129   :  { %v343_v33 = vadd.f32 %v342_v32, %v341_v31 }
 0x12b   :  { %v344_v34 = vrot.slane %v343_v33, 2 }
 0x12d   :  { %v345_v35 = vadd.f32 %v344_v34, %v343_v33 }
 0x12f   :  { %v346_v36 = vrot.slane %v345_v35, 1 }
 0x131   :  { %v347_v38 = vadd.f32 %v346_v36, %v345_v35 }
 0x133   :  { %v350_v39 = vadd.f32 %v349_v37, %v347_v38 }
 0x135   :  { %v387_v40 = vmul.f32 -1.442695, %v350_v39 }
 0x137   :  { %507 = vpow2.f32 %v387_v40 }
 0x144   :  { %v508_v41 = vpop.eup %507 }
 0x145   :  { %v354_v42 = vadd.f32 1.0, %v508_v41 }
 0x147   :  { %509 = vrcp.f32 %v354_v42 }
 0x154   :  { %v510_v43 = vpop.eup %509 }
 0x155   :  { %v357_v44 = vmul.f32 100.0, %v510_v43 }
 0x157   :  { %358 = vst [vmem:[%s745_s5] sm:$0x1] %v357_v44 }

</bundles_post_ra>
